<compile_context>
chip_gen: v6e
topology: v6e:2x2x1
jax: 0.10.0
libtpu: 0.0.40
codegen_flags: <defaults>
</compile_context>

<pallas_src>
import math

import jax
import jax.numpy as jnp
from jax.experimental import pallas as pl
from jax.experimental.pallas import tpu as pltpu

ALPHA = 0.25
GAMMA = 2                    # hard-coded as an explicit square in the kernel
LANES = 128                  # full-vreg lane width
SUBLANES = 8                 # B*56 is always divisible by 8 -> copy-free [8, N] view
LANE_BLOCK = 65536           # 8 * 65536 * 4 B = 2 MiB per buffer (12 MiB live, dbl-buffered)
MIN_PALLAS_ELEMS = 1 << 20   # below this, fused jnp is already at the HBM roofline


def _focal_pointwise(x, t):
    """Exact elementwise focal-loss math (shared by kernel and jnp fallback)."""
    # binary_cross_entropy_with_logits, reduction='none' (numerically stable)
    bce = jnp.maximum(x, 0.0) - x * t + jnp.log1p(jnp.exp(-jnp.abs(x)))
    # at = alpha.gather(0, where(t == 0, 0, 1)) with alpha = [ALPHA, 1 - ALPHA]
    at = jnp.where(t == 0.0, jnp.float32(ALPHA), jnp.float32(1.0 - ALPHA))
    pt = jnp.exp(-bce)
    one_m_pt = 1.0 - pt
    # gamma == 2 -> explicit multiply on the VPU, never an EUP pow
    return at * (one_m_pt * one_m_pt) * bce


def _focal_loss_kernel(x_ref, t_ref, out_ref):
    out_ref[...] = _focal_pointwise(x_ref[...], t_ref[...])


def weighted_focal_loss(inputs, targets, *,
                        lane_block=LANE_BLOCK,
                        min_pallas_elems=MIN_PALLAS_ELEMS):
    """inputs, targets: float32 [B, 56]; returns F_loss float32 [B, 56]."""
    assert inputs.shape == targets.shape
    assert inputs.ndim == 2 and inputs.shape[-1] == 56, \
        "module hard-codes .view(-1, 56)"
    orig_shape = inputs.shape
    total = math.prod(orig_shape)

    x = inputs.astype(jnp.float32)
    t = targets.astype(jnp.float32)

    # Small-input dispatch: launch overhead dominates, XLA fusion is already optimal.
    if total < min_pallas_elems:
        return _focal_pointwise(x, t).reshape(orig_shape)

    # Copy-free lane-major view: [B, 56] -> [8, B*7].  No padding, no slicing, no
    # concatenation for any B; the ragged final lane-block is masked by Pallas.
    n = total // SUBLANES
    x2 = x.reshape(SUBLANES, n)
    t2 = t.reshape(SUBLANES, n)

    # Main-path blocks are a multiple of 128 lanes (full vregs, unmasked stores).
    # A single full-extent block is always legal when the array is small.
    if n <= lane_block:
        bl = n
    else:
        bl = max(LANES, (lane_block // LANES) * LANES)
    grid = (pl.cdiv(n, bl),)
    spec = pl.BlockSpec((SUBLANES, bl), lambda i: (0, i))

    out2 = pl.pallas_call(
        _focal_loss_kernel,
        out_shape=jax.ShapeDtypeStruct((SUBLANES, n), jnp.float32),
        grid=grid,
        in_specs=[spec, spec],
        out_specs=spec,
        compiler_params=pltpu.CompilerParams(
            # 3 arrays x 2 buffers x 2 MiB = 12 MiB -> fits every chip's default
            # scoped VMEM (16 MiB v5e, 32 MiB v6e/v7x); no vmem_limit flag needed.
            dimension_semantics=("parallel",)),
        cost_estimate=pl.CostEstimate(
            flops=10 * total,
            transcendentals=3 * total,
            bytes_accessed=12 * total),
    )(x2, t2)

    return out2.reshape(orig_shape)


def _reference(inputs, targets):
    bce = jnp.maximum(inputs, 0.0) - inputs * targets + jnp.log1p(jnp.exp(-jnp.abs(inputs)))
    at = jnp.where(targets == 0.0, ALPHA, 1.0 - ALPHA)
    pt = jnp.exp(-bce)
    return at * (1.0 - pt) ** GAMMA * bce


if __name__ == "__main__":
    key = jax.random.PRNGKey(0)
    F_DIM = 56  # required by the module's hard-coded reshape
    ok = True

    # Forced through the Pallas path (min_pallas_elems=0) at small shapes:
    #   B=16  -> n=112: single full-extent block (aligned path)
    #   B=7   -> n=49 : unaligned batch, handled with zero padding/copies
    #   B=128 -> n=896, lane_block=384: 3 grid steps, ragged final block
    #   B=2048-> n=14336, lane_block=4096: 4 pipelined steps, ragged final block
    cases = [
        (16,   dict(min_pallas_elems=0)),
        (7,    dict(min_pallas_elems=0)),
        (128,  dict(min_pallas_elems=0, lane_block=384)),
        (2048, dict(min_pallas_elems=0, lane_block=4096)),
    ]
    for batch, kwargs in cases:
        key, kx, kt = jax.random.split(key, 3)
        logits = jax.random.normal(kx, (batch, F_DIM), dtype=jnp.float32)
        targs = jax.random.bernoulli(kt, p=0.3, shape=(batch, F_DIM)).astype(jnp.float32)

        out = jax.block_until_ready(weighted_focal_loss(logits, targs, **kwargs))
        ref = _reference(logits, targs)
        ok = ok and (out.shape == (batch, F_DIM))
        ok = ok and bool(jnp.allclose(out, ref, atol=1e-5, rtol=1e-5))

    # Default dispatch on a tiny input exercises the fused-jnp fallback path.
    key, kx, kt = jax.random.split(key, 3)
    logits = jax.random.normal(kx, (16, F_DIM), dtype=jnp.float32)
    targs = jax.random.bernoulli(kt, p=0.3, shape=(16, F_DIM)).astype(jnp.float32)
    out = jax.block_until_ready(weighted_focal_loss(logits, targs))
    ok = ok and bool(jnp.allclose(out, _reference(logits, targs), atol=1e-5, rtol=1e-5))

    assert ok
    print("KERNEL_OK")
</pallas_src>

<mosaic_0001>
module attributes {stable_mosaic.version = 11 : i64} {
  func.func @_focal_loss_kernel(%arg0: i32, %arg1: memref<8x112xf32, #tpu.memory_space<vmem>>, %arg2: memref<8x112xf32, #tpu.memory_space<vmem>>, %arg3: memref<8x112xf32, #tpu.memory_space<vmem>>) attributes {dimension_semantics = [#tpu.dimension_semantics<parallel>], iteration_bounds = array<i64: 1>, scalar_prefetch = 0 : i64, scratch_operands = 0 : i64, tpu.core_type = #tpu.core_type<tc>, window_params = [{transform_indices = @transform_0, window_bounds = array<i64: 8, 112>}, {transform_indices = @transform_1, window_bounds = array<i64: 8, 112>}, {transform_indices = @transform_2, window_bounds = array<i64: 8, 112>}]} {
    %c0 = arith.constant 0 : index
    %c0_0 = arith.constant 0 : index
    %0 = vector.load %arg1[%c0, %c0_0] : memref<8x112xf32, #tpu.memory_space<vmem>>, vector<8x112xf32>
    %c0_1 = arith.constant 0 : index
    %c0_2 = arith.constant 0 : index
    %1 = vector.load %arg2[%c0_1, %c0_2] : memref<8x112xf32, #tpu.memory_space<vmem>>, vector<8x112xf32>
    %cst = arith.constant 0.000000e+00 : f32
    %2 = vector.broadcast %cst : f32 to vector<8x112xf32>
    %3 = arith.maximumf %0, %2 : vector<8x112xf32>
    %4 = arith.mulf %0, %1 : vector<8x112xf32>
    %5 = arith.subf %3, %4 : vector<8x112xf32>
    %6 = math.absf %0 : vector<8x112xf32>
    %cst_3 = arith.constant 0.000000e+00 : f32
    %7 = vector.broadcast %cst_3 : f32 to vector<8x112xf32>
    %8 = arith.subf %7, %6 : vector<8x112xf32>
    %9 = math.exp %8 : vector<8x112xf32>
    %10 = math.log1p %9 : vector<8x112xf32>
    %11 = arith.addf %5, %10 : vector<8x112xf32>
    %cst_4 = arith.constant 0.000000e+00 : f32
    %12 = vector.broadcast %cst_4 : f32 to vector<8x112xf32>
    %13 = arith.cmpf oeq, %1, %12 : vector<8x112xf32>
    %cst_5 = arith.constant 2.500000e-01 : f32
    %cst_6 = arith.constant 7.500000e-01 : f32
    %14 = vector.broadcast %cst_5 : f32 to vector<8x112xf32>
    %15 = vector.broadcast %cst_6 : f32 to vector<8x112xf32>
    %16 = arith.select %13, %14, %15 : vector<8x112xi1>, vector<8x112xf32>
    %cst_7 = arith.constant 0.000000e+00 : f32
    %17 = vector.broadcast %cst_7 : f32 to vector<8x112xf32>
    %18 = arith.subf %17, %11 : vector<8x112xf32>
    %19 = math.exp %18 : vector<8x112xf32>
    %cst_8 = arith.constant 1.000000e+00 : f32
    %20 = vector.broadcast %cst_8 : f32 to vector<8x112xf32>
    %21 = arith.subf %20, %19 : vector<8x112xf32>
    %22 = arith.mulf %21, %21 : vector<8x112xf32>
    %23 = arith.mulf %16, %22 : vector<8x112xf32>
    %24 = arith.mulf %23, %11 : vector<8x112xf32>
    %c0_9 = arith.constant 0 : index
    %c0_10 = arith.constant 0 : index
    %25 = vector.load %arg3[%c0_9, %c0_10] : memref<8x112xf32, #tpu.memory_space<vmem>>, vector<8x112xf32>
    tpu.vector_store %arg3[%c0_9, %c0_10], %24 {strides = array<i32>} : memref<8x112xf32, #tpu.memory_space<vmem>>, vector<8x112xf32>,
    return
  }
  func.func @transform_0(%arg0: i32) -> (i32, i32) {
    %c0_i32 = arith.constant 0 : i32
    %c0_i32_0 = arith.constant 0 : i32
    return %c0_i32, %arg0 : i32, i32
  }
  func.func @transform_1(%arg0: i32) -> (i32, i32) {
    %c0_i32 = arith.constant 0 : i32
    %c0_i32_0 = arith.constant 0 : i32
    return %c0_i32, %arg0 : i32, i32
  }
  func.func @transform_2(%arg0: i32) -> (i32, i32) {
    %c0_i32 = arith.constant 0 : i32
    %c0_i32_0 = arith.constant 0 : i32
    return %c0_i32, %arg0 : i32, i32
  }
}

</mosaic_0001>

<bundles_post_ra>
// kernel: tpu_custom_call.1
= control target key start
LH: loop header
LB: loop body
LE: loop exit
PB: predicated region body
PF: predicated region fallthrough
CT: control target
= control target key end

     0   :  { %7 = vsyncpa [#allocation3], 0  ;;  %s186_s0 = inlined_call_operand.hbm [shape: f32[8,112], index: 0, kind: input, shape index: {}]   ;;  %s187_s1 = inlined_call_operand.hbm [shape: f32[8,112], index: 1, kind: input, shape index: {}]   ;;  %s188_s2 = inlined_call_operand.hbm [shape: f32[8,112], index: 2, kind: output, shape index: {}]  }
   0x1   :  { %8 = vsyncpa [#allocation6], 0 }
   0x2   :  { %9 = vsyncpa [#allocation4], 0  ;;  %s158_s9 = smov [#allocation2]   ;;  %s159_s11 = smov [#allocation5]  }
   0x3   :  { %s16_s10 = sshll.u32 %s158_s9, 4  ;;  %s26_s12 = sshll.u32 %s159_s11, 4  ;;  %s17_s10 = int_to_ptr.vmem [resolvable:$true] %s16_s10  ;;  %s27_s12 = int_to_ptr.vmem [resolvable:$true] %s26_s12 }
   0x4   :  { %s100_s13 = scalar_lea.vmem %s17_s10, 128  ;;  %p105_p1 = scmp.lt.s32.totalorder %s17_s10, %s17_s10 }
   0x5   :  { %p101_p0 = scmp.ne.s32.totalorder %s17_s10, %s100_s13  ;;  %p106_p2 = scmp.lt.s32.totalorder %s100_s13, %s100_s13 }
   0x7   :  { %p107_p3 = por %p106_p2, %p105_p1 }
   0x9   :  { %p108_p4 = pnand %p107_p3, %p101_p0 }
   0xb   :  { %111 = shalt.err (!%p108_p4)
}
   0xc   :  { %19 = dma.hbm_to_vmem [thread:$0]  %s186_s0, 128, %s17_s10, [#allocation3]  }
   0xd   :  { %s120_s16 = scalar_lea.vmem %s27_s12, 128  ;;  %p125_p6 = scmp.lt.s32.totalorder %s27_s12, %s27_s12 }
   0xe   :  { %p121_p5 = scmp.ne.s32.totalorder %s27_s12, %s120_s16  ;;  %p126_p7 = scmp.lt.s32.totalorder %s120_s16, %s120_s16 }
  0x10   :  { %p127_p8 = por %p126_p7, %p125_p6 }
  0x12   :  { %p128_p9 = pnand %p127_p8, %p121_p5 }
  0x14   :  { %131 = shalt.err (!%p128_p9)
}
  0x15   :  { %29 = dma.hbm_to_vmem [thread:$0]  %s187_s1, 128, %s27_s12, [#allocation6]  }
  0x16   :  { %152 = dma.done.wait [#allocation3], 128  }
  0x17   :  { %153 = vsyncadd [#allocation3], 4294967168 }
  0x18   :  { %154 = dma.done.wait [#allocation6], 128  }
  0x19   :  { %155 = vsyncadd [#allocation6], 4294967168  ;;  %v36_v0 = vld [vmem:[#allocation2] sm:$0xff]  ;;  %v37_v7 = vld [vmem:[#allocation5] sm:$0xff]  ;;  %v160_v22 = vmov 0.75   ;;  %s161_s0 = smov [#allocation7]  }
  0x1a   :  { %v41_v1 = vand.u32 2147483647, %v36_v0  ;;  %v38_v9 = vmax.f32 %v36_v0, 0.0  ;;  %v39_v10 = vmul.f32 %v37_v7, %v36_v0  ;;  %vm55_vm1 = vcmp.eq.f32.partialorder %v37_v7, 0.0  ;;  %s72_s1 = sshll.u32 %s161_s0, 4  ;;  %s73_s1 = int_to_ptr.vmem [resolvable:$true] %s72_s1 }
  0x1b   :  { %v56_v23 = vsel %vm55_vm1, 0.25, %v160_v22  ;;  %vm64_vm2 = vcmask 916480   ;;  %s132_s19 = scalar_lea.vmem %s73_s1, 128  ;;  %p137_p11 = scmp.lt.s32.totalorder %s73_s1, %s73_s1 }
  0x1c   :  { %v42_v2 = vsub.f32 0.0, %v41_v1  ;;  %v40_v14 = vsub.f32 %v38_v9, %v39_v10  ;;  %p133_p10 = scmp.ne.s32.totalorder %s73_s1, %s132_s19  ;;  %p138_p12 = scmp.lt.s32.totalorder %s132_s19, %s132_s19 }
  0x1e   :  { %v43_v3 = vmul.f32 1.442695, %v42_v2  ;;  %p139_p13 = por %p138_p12, %p137_p11 }
  0x20   :  { %86 = vpow2.f32 %v43_v3  ;;  %p140_p0 = pnand %p139_p13, %p133_p10 }
  0x2d   :  { %v87_v4 = vpop.eup %86 }
  0x2e   :  { %v45_v5 = vadd.f32 1.0, %v87_v4  ;;  %v48_v6 = vmul.f32 -0.5, %v87_v4  ;;  %v51_v11 = vand.u32 2147483647, %v87_v4 }
  0x30   :  { %88 = vlog2.f32 %v45_v5  ;;  %v49_v8 = vadd.f32 1.0, %v48_v6  ;;  %vm52_vm0 = vcmp.lt.f32.partialorder %v51_v11, 0.0004427343 }
  0x32   :  { %v50_v12 = vmul.f32 %v87_v4, %v49_v8 }
  0x3d   :  { %v89_v13 = vpop.eup %88 }
  0x3e   :  { %v47_v15 = vmul.f32 0.6931472, %v89_v13 }
  0x40   :  { %v53_v16 = vsel %vm52_vm0, %v50_v12, %v47_v15 }
  0x41   :  { %v54_v17 = vadd.f32 %v53_v16, %v40_v14 }
  0x43   :  { %v57_v18 = vsub.f32 0.0, %v54_v17 }
  0x45   :  { %v58_v19 = vmul.f32 1.442695, %v57_v18 }
  0x47   :  { %90 = vpow2.f32 %v58_v19 }
  0x54   :  { %v91_v20 = vpop.eup %90 }
  0x55   :  { %v60_v21 = vsub.f32 1.0, %v91_v20 }
  0x57   :  { %v61_v24 = vmul.f32 %v60_v21, %v60_v21 }
  0x59   :  { %v62_v25 = vmul.f32 %v61_v24, %v56_v23 }
  0x5b   :  { %v63_v26 = vmul.f32 %v62_v25, %v54_v17 }
  0x5d   :  { %65 = vst.msk [vmem:[#allocation7] sm:$0xff] %vm64_vm2, %v63_v26 }
  0x5e   :  { %143 = shalt.err (!%p140_p0)
}
  0x5f   :  { %75 = dma.vmem_to_hbm [thread:$0]  %s73_s1, 128, %s188_s2, [#allocation4]  }
  0x60   :  { %156 = dma.done.wait [#allocation4], 128  }
  0x61   :  { %157 = vsyncadd [#allocation4], 4294967168 }
  0x62   :  { %79 = vsyncpa [#allocation3], 1 }
  0x63   :  { %80 = vsyncpa [#allocation6], 1 }
  0x64   :  { %81 = vsyncpa [#allocation4], 1 }

</bundles_post_ra>
